<compile_context>
chip_gen: v5e
topology: v5e:2x2
jax: 0.10.0
libtpu: 0.0.40
codegen_flags: <defaults>
</compile_context>

<pallas_src>
import jax
import jax.numpy as jnp
from jax.experimental import pallas as pl
from jax.experimental.pallas import tpu as pltpu


def _stanh_kernel(x_ref, o_ref):
    # min(1, max(x, -1)) — two VPU ops per element, fully hidden under the DMA.
    x = x_ref[...]
    o_ref[...] = jnp.minimum(jnp.maximum(x, -1.0), 1.0).astype(o_ref.dtype)


def stanh(x, *, target_tile_bytes=2 * 1024 * 1024):
    """Elementwise clamp of `x` to [-1, 1] via a single streaming Pallas kernel."""
    orig_shape = x.shape
    dtype = x.dtype

    flat = x.reshape(-1)
    n = flat.shape[0]
    if n == 0:
        return x

    # ---- lane-dense 2-D slab (rows, W), W a multiple of 128 -----------------
    # Prefer the widest W that divides n exactly: typical conv activations have
    # element counts that are multiples of 1024+, so the hot path is pad-free
    # (no extra HBM read+write outside the kernel).
    lanes = 128
    for w in (4096, 2048, 1024, 512, 256, 128):
        if n % w == 0:
            lanes = w
            break

    padded_n = pl.cdiv(n, lanes) * lanes
    if padded_n != n:
        # Only reached when n is not even a multiple of 128; pads < 128 elems.
        flat = jnp.pad(flat, (0, padded_n - n))
    rows = padded_n // lanes
    x2d = flat.reshape(rows, lanes)

    # ---- row tile: ~2 MiB per block ------------------------------------------
    # Big enough to amortize the ~0.35 us per-grid-step overhead and reach the
    # HBM roofline; small enough that 2x(in)+2x(out) double-buffering is ~8 MiB,
    # safe on every generation (incl. v7x).  Multiple of 32 sublanes so f32 /
    # bf16 / int8 packing all get unmasked full tiles.
    itemsize = jnp.dtype(dtype).itemsize
    tr = max(32, target_tile_bytes // (lanes * itemsize))
    tr -= tr % 32
    if tr >= rows:
        tr = rows  # single full-array block (always a legal block shape)

    # Ragged last block is fine: OOB reads are unused garbage, OOB writes dropped.
    grid = (pl.cdiv(rows, tr),)

    out2d = pl.pallas_call(
        _stanh_kernel,
        out_shape=jax.ShapeDtypeStruct((rows, lanes), dtype),
        grid_spec=pltpu.PrefetchScalarGridSpec(
            num_scalar_prefetch=0,
            grid=grid,
            in_specs=[pl.BlockSpec((tr, lanes), lambda i: (i, 0))],
            out_specs=pl.BlockSpec((tr, lanes), lambda i: (i, 0)),
        ),
        compiler_params=pltpu.CompilerParams(
            dimension_semantics=("parallel",),  # shards grid across TCs on v7x
        ),
    )(x2d)

    out = out2d.reshape(-1)
    if padded_n != n:
        out = out[:n]
    return out.reshape(orig_shape)


if __name__ == "__main__":
    key = jax.random.PRNGKey(0)
    # NCHW input, consistent with typical conv-net activations.
    x = jax.random.normal(key, (2, 4, 16, 16), dtype=jnp.float32) * 3.0

    y = stanh(x)
    jax.block_until_ready(y)

    # Reference check in plain JAX (matches simple_tanh: min(1, max(x, -1))).
    y_ref = jnp.minimum(jnp.ones_like(x), jnp.maximum(x, -jnp.ones_like(x)))
    assert y.shape == x.shape and y.dtype == x.dtype
    assert jnp.allclose(y, y_ref), "mismatch vs reference clamp"

    # Also exercise the awkward-size (padding) path.
    x2 = jax.random.normal(jax.random.PRNGKey(1), (3, 5, 7, 11), dtype=jnp.float32) * 3.0
    y2 = stanh(x2)
    jax.block_until_ready(y2)
    assert jnp.allclose(y2, jnp.clip(x2, -1.0, 1.0)), "mismatch vs reference clamp (ragged)"

    print("KERNEL_OK")
</pallas_src>

<mosaic_0001>
module attributes {stable_mosaic.version = 11 : i64} {
  func.func @_stanh_kernel(%arg0: i32, %arg1: memref<1x2048xf32, #tpu.memory_space<vmem>>, %arg2: memref<1x2048xf32, #tpu.memory_space<vmem>>) attributes {dimension_semantics = [#tpu.dimension_semantics<parallel>], iteration_bounds = array<i64: 1>, scalar_prefetch = 0 : i64, scratch_operands = 0 : i64, tpu.core_type = #tpu.core_type<tc>, window_params = [{transform_indices = @transform_0, window_bounds = array<i64: 1, 2048>}, {transform_indices = @transform_1, window_bounds = array<i64: 1, 2048>}]} {
    %c0 = arith.constant 0 : index
    %c0_0 = arith.constant 0 : index
    %0 = vector.load %arg1[%c0, %c0_0] : memref<1x2048xf32, #tpu.memory_space<vmem>>, vector<1x2048xf32>
    %cst = arith.constant -1.000000e+00 : f32
    %1 = vector.broadcast %cst : f32 to vector<1x2048xf32>
    %2 = arith.maximumf %0, %1 : vector<1x2048xf32>
    %cst_1 = arith.constant 1.000000e+00 : f32
    %3 = vector.broadcast %cst_1 : f32 to vector<1x2048xf32>
    %4 = arith.minimumf %2, %3 : vector<1x2048xf32>
    %c0_2 = arith.constant 0 : index
    %c0_3 = arith.constant 0 : index
    %5 = vector.load %arg2[%c0_2, %c0_3] : memref<1x2048xf32, #tpu.memory_space<vmem>>, vector<1x2048xf32>
    tpu.vector_store %arg2[%c0_2, %c0_3], %4 {strides = array<i32>} : memref<1x2048xf32, #tpu.memory_space<vmem>>, vector<1x2048xf32>,
    return
  }
  func.func @transform_0(%arg0: i32) -> (i32, i32) {
    %c0_i32 = arith.constant 0 : i32
    %c0_i32_0 = arith.constant 0 : i32
    return %arg0, %c0_i32 : i32, i32
  }
  func.func @transform_1(%arg0: i32) -> (i32, i32) {
    %c0_i32 = arith.constant 0 : i32
    %c0_i32_0 = arith.constant 0 : i32
    return %arg0, %c0_i32 : i32, i32
  }
}

</mosaic_0001>

<bundles_post_ra>
// kernel: tpu_custom_call.1
= control target key start
LH: loop header
LB: loop body
LE: loop exit
PB: predicated region body
PF: predicated region fallthrough
CT: control target
= control target key end

     0   :  { %6 = vsyncpa [#allocation3], 0  ;;  %s122_s0 = inlined_call_operand.hbm [shape: f32[1,2048], index: 0, kind: input, shape index: {}]   ;;  %s123_s1 = inlined_call_operand.hbm [shape: f32[1,2048], index: 1, kind: output, shape index: {}]  }
   0x1   :  { %7 = vsyncpa [#allocation4], 0  ;;  %s13_s8 = sshll.u32 %s122_s0, 4  ;;  %s104_s9 = smov [#allocation2]   ;;  %s14_s8 = int_to_ptr.hbm [resolvable:$true] %s13_s8 }
   0x2   :  { %s15_s10 = sshll.u32 %s104_s9, 4  ;;  %s16_s10 = int_to_ptr.vmem [resolvable:$true] %s15_s10 }
   0x3   :  { %18 = dma.hbm_to_vmem [thread:$0]  %s14_s8, 256, %s16_s10, [#allocation3]  }
   0x4   :  { %100 = dma.done.wait [#allocation3], 256  }
   0x5   :  { %101 = vsyncadd [#allocation3], 4294967040  ;;  %s105_s11 = smov [#allocation5]   ;;  %s38_s15 = sshll.u32 %s123_s1, 4  ;;  %v23_v0 = vld [vmem:[#allocation2] sm:$0xff]  ;;  %v24_v1 = vld [vmem:[#allocation2 + $0x8] sm:$0xff]  ;;  %s39_s15 = int_to_ptr.hbm [resolvable:$true] %s38_s15 }
   0x6   :  { %s36_s12 = sshll.u32 %s105_s11, 4  ;;  %v48_v2 = vclamps-f32 %v23_v0, 1.0  ;;  %v49_v3 = vclamps-f32 %v24_v1, 1.0  ;;  %s37_s12 = int_to_ptr.vmem [resolvable:$true] %s36_s12 }
   0x8   :  { %29 = vst [vmem:[#allocation5] sm:$0xff] %v48_v2 }
   0x9   :  { %30 = vst [vmem:[#allocation5 + $0x8] sm:$0xff] %v49_v3 }
   0xa   :  { %41 = dma.vmem_to_hbm [thread:$0]  %s37_s12, 256, %s39_s15, [#allocation4]  }
   0xb   :  { %102 = dma.done.wait [#allocation4], 256  }
   0xc   :  { %103 = vsyncadd [#allocation4], 4294967040 }
   0xd   :  { %46 = vsyncpa [#allocation3], 1 }
   0xe   :  { %47 = vsyncpa [#allocation4], 1 }

</bundles_post_ra>
